<compile_context>
chip_gen: v6e
topology: v6e:2x2x1
jax: 0.10.0
libtpu: 0.0.40
codegen_flags: <defaults>
</compile_context>

<pallas_src>
import jax
import jax.numpy as jnp
from jax.experimental import pallas as pl
from jax.experimental.pallas import tpu as pltpu


def _perceptron_kernel(x_ref, w_ref, b_ref, o_ref):
    # x_ref: (TB, D)   VMEM, native dtype (pipelined per batch tile)
    # w_ref: (1, D)    VMEM (resident across grid steps)
    # b_ref: (1,)      SMEM scalar (f32)
    # o_ref: (1, TB)   VMEM, lane-dense output row for this batch tile
    #
    # NT contraction: (1, D) . (TB, D)^T -> (1, TB); MXU, f32 accumulation.
    logits = jax.lax.dot_general(
        w_ref[...],
        x_ref[...],
        dimension_numbers=(((1,), (1,)), ((), ())),
        preferred_element_type=jnp.float32,
    )
    logits = logits + b_ref[0]                      # scalar bias broadcast
    o_ref[...] = jax.nn.sigmoid(logits).astype(o_ref.dtype)


def perceptron_forward(x, weight, bias, *, max_tile=2048,
                       vmem_budget_bytes=8 * 1024 * 1024):
    """x: (batch, input_dim); weight: (1, input_dim); bias: (1,) -> (batch, 1)."""
    batch, input_dim = x.shape
    dtype_bytes = jnp.dtype(x.dtype).itemsize

    # Batch tile: as large as keeps the 2 double-buffered x tiles under the
    # VMEM budget.  For the multi-tile path, TB is a multiple of 128 so the
    # lane-dense (1, TB) output block obeys the (8, 128) tiling rule; the
    # (possibly ragged) final tile is handled by Pallas partial-block masking.
    budget_rows = (vmem_budget_bytes // (2 * max(1, input_dim) * dtype_bytes))
    budget_rows = (budget_rows // 128) * 128
    tb = min(max_tile, max(128, budget_rows))
    if batch <= tb:
        tb = batch                          # single tile: block == full array dims
    n_tiles = pl.cdiv(batch, tb)

    w = weight.reshape(1, input_dim)        # as given, no transpose
    b = bias.reshape(1).astype(jnp.float32)  # SMEM scalar

    out_row = pl.pallas_call(
        _perceptron_kernel,
        out_shape=jax.ShapeDtypeStruct((1, batch), x.dtype),
        grid_spec=pltpu.PrefetchScalarGridSpec(
            num_scalar_prefetch=0,
            grid=(n_tiles,),
            in_specs=[
                pl.BlockSpec((tb, input_dim), lambda i: (i, 0)),    # x tile (pipelined)
                pl.BlockSpec((1, input_dim), lambda i: (0, 0)),     # weight, resident
                pl.BlockSpec(memory_space=pltpu.MemorySpace.SMEM),  # bias scalar
            ],
            out_specs=pl.BlockSpec((1, tb), lambda i: (0, i)),      # lane-dense row
        ),
        compiler_params=pltpu.CompilerParams(
            dimension_semantics=("parallel",),   # megacore-shard the batch axis
            vmem_limit_bytes=32 * 1024 * 1024,
        ),
        cost_estimate=pl.CostEstimate(
            flops=2 * batch * input_dim,
            transcendentals=batch,
            bytes_accessed=(batch * input_dim + input_dim) * dtype_bytes
            + batch * dtype_bytes,
        ),
    )(x, w, b)

    # (1, batch) lane-dense slab -> (batch, 1) column (layout plumbing done
    # outside the kernel, not in the store path).
    return out_row.reshape(batch, 1)


if __name__ == "__main__":
    batch, input_dim = 8, 32

    key = jax.random.PRNGKey(0)
    kx, kw, kb = jax.random.split(key, 3)

    # Deterministic init mimicking nn.Linear defaults: U(-1/sqrt(in), 1/sqrt(in))
    bound = 1.0 / jnp.sqrt(jnp.float32(input_dim))
    weight = jax.random.uniform(kw, (1, input_dim), jnp.float32, -bound, bound)
    bias = jax.random.uniform(kb, (1,), jnp.float32, -bound, bound)

    x = jax.random.normal(kx, (batch, input_dim), jnp.float32)

    out = perceptron_forward(x, weight, bias)
    out = jax.block_until_ready(out)

    ref = jax.nn.sigmoid(x @ weight.T + bias)
    assert out.shape == (batch, 1)
    assert jnp.allclose(out, ref, atol=1e-5, rtol=1e-5)

    # Second check: exercise the multi-tile pipelined path with a batch that is
    # not a multiple of the tile (ragged last block + "parallel" grid axis).
    batch2 = 200
    x2 = jax.random.normal(jax.random.PRNGKey(1), (batch2, input_dim), jnp.float32)
    out2 = jax.block_until_ready(
        perceptron_forward(x2, weight, bias, max_tile=128))
    ref2 = jax.nn.sigmoid(x2 @ weight.T + bias)
    assert out2.shape == (batch2, 1)
    assert jnp.allclose(out2, ref2, atol=1e-5, rtol=1e-5)

    print("KERNEL_OK")
</pallas_src>

<mosaic_0001>
module attributes {stable_mosaic.version = 11 : i64} {
  func.func @_perceptron_kernel(%arg0: i32, %arg1: memref<8x32xf32, #tpu.memory_space<vmem>>, %arg2: memref<1x32xf32, #tpu.memory_space<vmem>>, %arg3: memref<1xf32, #tpu.memory_space<smem>>, %arg4: memref<1x8xf32, #tpu.memory_space<vmem>>) attributes {dimension_semantics = [#tpu.dimension_semantics<parallel>], iteration_bounds = array<i64: 1>, scalar_prefetch = 0 : i64, scratch_operands = 0 : i64, tpu.core_type = #tpu.core_type<tc>, window_params = [{transform_indices = @transform_0, window_bounds = array<i64: 8, 32>}, {pipeline_mode = #tpu.pipeline_mode<synchronous>, transform_indices = @transform_1, window_bounds = array<i64: 1, 32>}, {transform_indices = @transform_2, window_bounds = array<i64: 1>}, {transform_indices = @transform_3, window_bounds = array<i64: 1, 8>}]} {
    %c0 = arith.constant 0 : index
    %c0_0 = arith.constant 0 : index
    %0 = vector.load %arg2[%c0, %c0_0] : memref<1x32xf32, #tpu.memory_space<vmem>>, vector<1x32xf32>
    %c0_1 = arith.constant 0 : index
    %c0_2 = arith.constant 0 : index
    %1 = vector.load %arg1[%c0_1, %c0_2] : memref<8x32xf32, #tpu.memory_space<vmem>>, vector<8x32xf32>
    %cst = arith.constant dense<0.000000e+00> : vector<1x8xf32>
    %2 = tpu.matmul %0, %1, %cst {dimension_numbers = #tpu.dot_dimension_numbers<[1], [1], [0], [0], [0, 0, 1, 0], [], []>} : vector<1x32xf32>, vector<8x32xf32>, vector<1x8xf32> -> vector<1x8xf32>
    %c0_3 = arith.constant 0 : index
    %3 = memref.load %arg3[%c0_3] : memref<1xf32, #tpu.memory_space<smem>>
    %4 = vector.broadcast %3 : f32 to vector<1x8xf32>
    %5 = arith.addf %2, %4 : vector<1x8xf32>
    %6 = arith.negf %5 : vector<1x8xf32>
    %7 = math.exp %6 : vector<1x8xf32>
    %cst_4 = arith.constant 1.000000e+00 : f32
    %8 = vector.broadcast %cst_4 : f32 to vector<1x8xf32>
    %9 = arith.addf %8, %7 : vector<1x8xf32>
    %10 = arith.divf %8, %9 : vector<1x8xf32>
    %c0_5 = arith.constant 0 : index
    %c0_6 = arith.constant 0 : index
    %11 = vector.load %arg4[%c0_5, %c0_6] : memref<1x8xf32, #tpu.memory_space<vmem>>, vector<1x8xf32>
    tpu.vector_store %arg4[%c0_5, %c0_6], %10 {strides = array<i32>} : memref<1x8xf32, #tpu.memory_space<vmem>>, vector<1x8xf32>,
    return
  }
  func.func @transform_0(%arg0: i32) -> (i32, i32) {
    %c0_i32 = arith.constant 0 : i32
    %c0_i32_0 = arith.constant 0 : i32
    return %arg0, %c0_i32 : i32, i32
  }
  func.func @transform_1(%arg0: i32) -> (i32, i32) {
    %c0_i32 = arith.constant 0 : i32
    %c0_i32_0 = arith.constant 0 : i32
    %c0_i32_1 = arith.constant 0 : i32
    return %c0_i32, %c0_i32_0 : i32, i32
  }
  func.func @transform_2(%arg0: i32) -> i32 {
    %c0_i32 = arith.constant 0 : i32
    %c0_i32_0 = arith.constant 0 : i32
    return %c0_i32 : i32
  }
  func.func @transform_3(%arg0: i32) -> (i32, i32) {
    %c0_i32 = arith.constant 0 : i32
    %c0_i32_0 = arith.constant 0 : i32
    return %c0_i32, %arg0 : i32, i32
  }
}

</mosaic_0001>

<bundles_post_ra>
// kernel: tpu_custom_call.1
= control target key start
LH: loop header
LB: loop body
LE: loop exit
PB: predicated region body
PF: predicated region fallthrough
CT: control target
= control target key end

     0   :  { %9 = vsyncpa [#allocation4], 0  ;;  %s230_s0 = inlined_call_operand.hbm [shape: f32[8,32], index: 0, kind: input, shape index: {}]   ;;  %s231_s1 = inlined_call_operand.vmem [shape: f32[1,32], index: 1, kind: input, shape index: {}]   ;;  %s232_s2 = inlined_call_operand.<no memory space> [shape: f32[1], index: 2, kind: input, shape index: {}]   ;;  %s233_s3 = inlined_call_operand.hbm [shape: f32[1,8], index: 3, kind: output, shape index: {}]  }
   0x1   :  { %10 = vsyncpa [#allocation5], 0  ;;  %s194_s12 = smov [#allocation3]  }
   0x2   :  { %s17_s13 = sshll.u32 %s194_s12, 4  ;;  %s18_s13 = int_to_ptr.vmem [resolvable:$true] %s17_s13 }
   0x3   :  { %s158_s14 = scalar_lea.vmem %s18_s13, 128  ;;  %p163_p1 = scmp.lt.s32.totalorder %s18_s13, %s18_s13 }
   0x4   :  { %p159_p0 = scmp.ne.s32.totalorder %s18_s13, %s158_s14  ;;  %p164_p2 = scmp.lt.s32.totalorder %s158_s14, %s158_s14 }
   0x6   :  { %p165_p3 = por %p164_p2, %p163_p1 }
   0x8   :  { %p166_p4 = pnand %p165_p3, %p159_p0 }
   0xa   :  { %169 = shalt.err (!%p166_p4)
}
   0xb   :  { %20 = dma.hbm_to_vmem [thread:$0]  %s230_s0, 128, %s18_s13, [#allocation4]  }
   0xc   :  { %190 = dma.done.wait [#allocation4], 128  }
   0xd   :  { %191 = vsyncadd [#allocation4], 4294967168  ;;  %v195_v0 = vmov 0.0   ;;  %vm196_vm0 = vmmov 0   ;;  %vm32_vm1 = vcmask 261120   ;;  %v29_v1 = vld [vmem:[#allocation3] sm:$0xff]  ;;  %v31_v3 = vstv %s232_s2 }
   0xe   :  { %137 = vmatprep.subr.mxu0 %v195_v0  ;;  %139 = vmatprep.mubr.msk.f32.mxu0 %vm196_vm0, %v195_v0  ;;  %v28_v2 = vld [vmem:[%s231_s1] sm:$0x1]  ;;  %s197_s0 = smov [#allocation6]   ;;  %vm115_vm2 = vcmask 57344  }
   0xf   :  { %138 = vmatpush3.xpose.msk.msra.mxu0 %vm32_vm1, %v29_v1  ;;  %s123_s21 = sshll.u32 %s197_s0, 4  ;;  %s124_s21 = int_to_ptr.vmem [resolvable:$true] %s123_s21 }
  0x10   :  { %s170_s1 = scalar_lea.vmem %s124_s21, 16  ;;  %s174_s22 = scalar_lea.vmem %s124_s21, 32 }
  0x11   :  { %p171_p5 = scmp.ne.s32.totalorder %s124_s21, %s170_s1  ;;  %p175_p6 = scmp.lt.s32.totalorder %s124_s21, %s124_s21 }
  0x12   :  { %140 = vmatmul.mubr.msk.f32.vlgmr.msra.gmra.mxu0 %vm32_vm1, %v28_v2  ;;  %p176_p7 = scmp.lt.s32.totalorder %s174_s22, %s170_s1 }
  0x14   :  { %p177_p8 = por %p176_p7, %p175_p6 }
  0x16   :  { %p178_p9 = pnand %p177_p8, %p171_p5 }
  0xd2   :  { %v105_v4 = vpop.f32.mrf.mxu0 }
  0xd3   :  { %v106_v5 = vadd.f32 %v105_v4, %v31_v3 }
  0xd4   :  { %v141_v6 = vpop.f32.mrf.mxu0 }
  0xd5   :  { %v134_v7 = vmul.f32 -1.442695, %v106_v5 }
  0xd7   :  { %146 = vpow2.f32 %v134_v7 }
  0xe4   :  { %v147_v8 = vpop.eup %146 }
  0xe5   :  { %v112_v9 = vadd.f32 1.0, %v147_v8 }
  0xe7   :  { %148 = vrcp.f32 %v112_v9 }
  0xf4   :  { %v149_v10 = vpop.eup %148 }
  0xf5   :  { %116 = vst.msk [vmem:[#allocation6] sm:$0x1] %vm115_vm2, %v149_v10 }
  0xf6   :  { %181 = shalt.err (!%p178_p9)
}
  0xf7   :  { %126 = dma.vmem_to_hbm [thread:$0]  %s124_s21, 16, %s233_s3, [#allocation5]  }
  0xf8   :  { %192 = dma.done.wait [#allocation5], 16  }
  0xf9   :  { %193 = vsyncadd [#allocation5], 4294967280 }
  0xfa   :  { %130 = vsyncpa [#allocation4], 1 }
  0xfb   :  { %131 = vsyncpa [#allocation5], 1 }

</bundles_post_ra>
